<compile_context>
chip_gen: v7x
topology: tpu7x:2x2x1
jax: 0.10.0
libtpu: 0.0.40
codegen_flags: <defaults>
</compile_context>

<pallas_src>
import functools
import math

import jax
import jax.numpy as jnp
from jax.experimental import pallas as pl
from jax.experimental.pallas import tpu as pltpu


def _round_up(x, m):
    return ((x + m - 1) // m) * m


def _physical_vmem_bytes():
    try:
        return int(pltpu.get_tpu_info().vmem_capacity_bytes)
    except Exception:
        return 64 * 1024 * 1024  # conservative: v7x per-TensorCore VMEM


def _vmem_bytes(tm, tn, Ep, cd_bytes, out_bytes):
    # Resident W is single-buffered; seq1/seq2/out tiles are double-buffered.
    w = Ep * Ep * cd_bytes
    s1 = 2 * tm * Ep * cd_bytes
    s2 = 2 * tn * Ep * cd_bytes
    out = 2 * tm * tn * out_bytes
    o1 = tm * Ep * cd_bytes
    return w + s1 + s2 + out + o1


def _select_tiles(Mp, Np, Ep, cd_bytes, out_bytes, budget):
    # Small E: each grid step is tiny -> bigger tn amortizes per-step overhead.
    tn = 512 if Ep <= 512 else 256
    tn = min(tn, Np)
    # Large E is seq2-read bound: seq2 HBM bytes/out-elem ~ 2*Ep/tm, so push tm
    # as high as the VMEM budget allows, then shrink until it fits.
    tm = min(512, Mp)
    while tm > 8 and _vmem_bytes(tm, tn, Ep, cd_bytes, out_bytes) > budget:
        tm = max(8, _round_up(tm // 2, 8))
    while tn > 128 and _vmem_bytes(tm, tn, Ep, cd_bytes, out_bytes) > budget:
        tn //= 2
    return tm, tn


def _atten_metrix_kernel(seq1_ref, w_ref, seq2_ref, out_ref, o1_ref, *, chunk_e):
    """Produce one (tm, tn) output tile.

    seq1_ref : (tm, Ep)  compute dtype
    w_ref    : (Ep, Ep)  compute dtype (constant block, single-buffered)
    seq2_ref : (tn, Ep)  compute dtype
    out_ref  : (tm, tn)  out dtype
    o1_ref   : (tm, Ep)  VMEM scratch carried across the j (N) axis
    """
    j = pl.program_id(1)
    Ep = w_ref.shape[1]
    n_chunks = Ep // chunk_e

    # o1 = seq1_tile @ W: compute once per M tile, cache across the N axis.
    @pl.when(j == 0)
    def _():
        if n_chunks == 1:
            o1 = jnp.dot(seq1_ref[...], w_ref[...],
                         preferred_element_type=jnp.float32)
            o1_ref[...] = o1.astype(o1_ref.dtype)
        else:
            # Chunk over Ep columns so the live f32 intermediate stays small.
            @pl.loop(0, n_chunks)
            def _(c):
                col = pl.multiple_of(c * chunk_e, chunk_e)
                o1 = jnp.dot(seq1_ref[...], w_ref[:, pl.ds(col, chunk_e)],
                             preferred_element_type=jnp.float32)
                o1_ref[:, pl.ds(col, chunk_e)] = o1.astype(o1_ref.dtype)

    # o2 = o1 @ seq2_tile^T as a dot_general contracting on E (no explicit
    # transpose / XLU vxpose); MXU accumulates in f32.
    o2 = jax.lax.dot_general(
        o1_ref[...], seq2_ref[...],
        dimension_numbers=(((1,), (1,)), ((), ())),
        preferred_element_type=jnp.float32)

    # tanh in the output dtype: f32 by default; bf16 output runs tanh on the
    # bf16 EUP path (v6e/v7x).  Store is lane-dense (tn is a 128 multiple).
    out_ref[...] = jnp.tanh(o2.astype(out_ref.dtype))


@functools.partial(
    jax.jit,
    static_argnames=("tm", "tn", "chunk_e", "Mp", "Np", "Ep",
                     "out_dtype", "compute_dtype", "vmem_limit"))
def _atten_metrix_impl(seq1, seq2, weight, *, tm, tn, chunk_e, Mp, Np, Ep,
                       out_dtype, compute_dtype, vmem_limit):
    M, E = seq1.shape
    N = seq2.shape[0]
    cd = jnp.dtype(compute_dtype)
    od = jnp.dtype(out_dtype)

    # Zero-pad only the contraction dim E (required: garbage there would
    # corrupt real outputs) plus minimal (8, 128) alignment for M / N.
    # Ragged final M/N grid tiles are handled by Pallas; their garbage only
    # lands in rows/cols that are never written back or are sliced off.
    def pad2(x, rows, cols):
        if rows or cols:
            x = jnp.pad(x, ((0, rows), (0, cols)))
        return x

    s1 = pad2(seq1, Mp - M, Ep - E).astype(cd)
    s2 = pad2(seq2, Np - N, Ep - E).astype(cd)
    w = pad2(weight, Ep - E, Ep - E).astype(cd)

    grid = (pl.cdiv(Mp, tm), pl.cdiv(Np, tn))
    n_m_tiles = grid[0]

    cost = pl.CostEstimate(
        flops=2 * Mp * Ep * Ep + 2 * Mp * Np * Ep,
        transcendentals=Mp * Np,
        bytes_accessed=(
            (Mp * Ep + Ep * Ep) * cd.itemsize          # seq1 + W read once
            + n_m_tiles * Np * Ep * cd.itemsize        # seq2 re-read per M tile
            + Mp * Np * od.itemsize),                  # output writeback
    )

    kernel = functools.partial(_atten_metrix_kernel, chunk_e=chunk_e)

    out = pl.pallas_call(
        kernel,
        out_shape=jax.ShapeDtypeStruct((Mp, Np), od),
        grid_spec=pltpu.PrefetchScalarGridSpec(
            num_scalar_prefetch=0,
            grid=grid,
            in_specs=[
                pl.BlockSpec((tm, Ep), lambda i, j: (i, 0)),   # seq1 tile
                pl.BlockSpec((Ep, Ep), lambda i, j: (0, 0),    # W: resident,
                             pipeline_mode=pl.Buffered(1)),    # single buffer
                pl.BlockSpec((tn, Ep), lambda i, j: (j, 0)),   # seq2 tile
            ],
            out_specs=pl.BlockSpec((tm, tn), lambda i, j: (i, j)),
            scratch_shapes=[pltpu.VMEM((tm, Ep), cd)],         # cached o1 tile
        ),
        compiler_params=pltpu.CompilerParams(
            dimension_semantics=("parallel", "arbitrary"),
            vmem_limit_bytes=vmem_limit,
        ),
        cost_estimate=cost,
    )(s1, w, s2)

    return out[:M, :N]


def atten_metrix(seq1, seq2, weight, *, out_dtype=None,
                 compute_dtype=jnp.bfloat16):
    """out = tanh(seq1 @ weight @ seq2^T); out_dtype defaults to seq1.dtype."""
    M, E = seq1.shape
    N, E2 = seq2.shape
    assert E == E2 == weight.shape[0] == weight.shape[1]

    od = jnp.dtype(out_dtype) if out_dtype is not None else jnp.dtype(seq1.dtype)
    cd = jnp.dtype(compute_dtype) if compute_dtype is not None else jnp.dtype(seq1.dtype)

    Ep = _round_up(E, 128)     # contraction dim: must be zero-padded
    Mp = _round_up(M, 8)       # sublane alignment only
    Np = _round_up(N, 128)     # lane-dense output stores

    phys = _physical_vmem_bytes()
    budget = int(phys * 0.80)  # headroom for Mosaic internal scratch / temps
    tm, tn = _select_tiles(Mp, Np, Ep, cd.itemsize, od.itemsize, budget)

    need = _vmem_bytes(tm, tn, Ep, cd.itemsize, od.itemsize)
    vmem_limit = int(min(phys * 15 // 16,
                         max(need * 5 // 4, 32 * 1024 * 1024)))

    # Chunk size for the first matmul (multiple of 128 dividing Ep).
    chunk_e = 512 if Ep % 512 == 0 else (256 if Ep % 256 == 0 else 128)
    chunk_e = min(chunk_e, Ep)

    return _atten_metrix_impl(
        seq1, seq2, weight,
        tm=tm, tn=tn, chunk_e=chunk_e, Mp=Mp, Np=Np, Ep=Ep,
        out_dtype=od, compute_dtype=cd, vmem_limit=vmem_limit)


def xavier_uniform(key, shape, gain):
    # Matches torch.nn.init.xavier_uniform_: bound = gain*sqrt(6/(fan_in+fan_out))
    fan_in, fan_out = shape[0], shape[1]
    bound = gain * math.sqrt(6.0 / (fan_in + fan_out))
    return jax.random.uniform(key, shape, dtype=jnp.float32,
                              minval=-bound, maxval=bound)


if __name__ == "__main__":
    embedding_size = 32
    M, N = 8, 8

    key = jax.random.PRNGKey(0)
    k_w, k_s1, k_s2 = jax.random.split(key, 3)

    # Deterministic parameter init (xavier_uniform, gain=sqrt(2), as in __init__).
    atten_weight = xavier_uniform(k_w, (embedding_size, embedding_size),
                                  gain=math.sqrt(2.0))
    seq1 = jax.random.normal(k_s1, (M, embedding_size), dtype=jnp.float32)
    seq2 = jax.random.normal(k_s2, (N, embedding_size), dtype=jnp.float32)

    out = atten_metrix(seq1, seq2, atten_weight)
    out = jax.block_until_ready(out)
    assert out.shape == (M, N)
    assert out.dtype == jnp.float32

    # Reference mirroring the kernel's bf16-operand / f32-accumulate numerics.
    def ref_mirror(s1, s2, w):
        cdt = jnp.bfloat16
        o1 = jnp.dot(s1.astype(cdt), w.astype(cdt),
                     preferred_element_type=jnp.float32).astype(cdt)
        o2 = jax.lax.dot_general(o1, s2.astype(cdt),
                                 dimension_numbers=(((1,), (1,)), ((), ())),
                                 preferred_element_type=jnp.float32)
        return jnp.tanh(o2)

    ref = ref_mirror(seq1, seq2, atten_weight)
    assert jnp.allclose(out, ref, atol=2e-3, rtol=2e-3)

    # Loose sanity check against the plain f32 PyTorch-style forward.
    ref_f32 = jnp.tanh((seq1 @ atten_weight) @ seq2.T)
    assert jnp.allclose(out, ref_f32, atol=1e-1, rtol=1e-1)

    print("KERNEL_OK")
</pallas_src>

<mosaic_0001>
module attributes {stable_mosaic.version = 11 : i64} {
  func.func @_atten_metrix_kernel(%arg0: i32, %arg1: i32, %arg2: memref<8x128xbf16, #tpu.memory_space<vmem>>, %arg3: memref<128x128xbf16, #tpu.memory_space<vmem>>, %arg4: memref<128x128xbf16, #tpu.memory_space<vmem>>, %arg5: memref<8x128xf32, #tpu.memory_space<vmem>>, %arg6: memref<8x128xbf16, #tpu.memory_space<vmem>>) attributes {dimension_semantics = [#tpu.dimension_semantics<parallel>, #tpu.dimension_semantics<arbitrary>], iteration_bounds = array<i64: 1, 1>, scalar_prefetch = 0 : i64, scratch_operands = 1 : i64, tpu.core_type = #tpu.core_type<tc>, window_params = [{transform_indices = @transform_0, window_bounds = array<i64: 8, 128>}, {pipeline_mode = #tpu.pipeline_mode<synchronous>, transform_indices = @transform_1, window_bounds = array<i64: 128, 128>}, {transform_indices = @transform_2, window_bounds = array<i64: 128, 128>}, {transform_indices = @transform_3, window_bounds = array<i64: 8, 128>}]} {
    %c0_i32 = arith.constant 0 : i32
    %0 = arith.cmpi eq, %arg1, %c0_i32 : i32
    %1 = arith.extui %0 : i1 to i32
    %c0_i32_0 = arith.constant 0 : i32
    %2 = arith.cmpi ne, %1, %c0_i32_0 : i32
    scf.if %2 {
      %c0_6 = arith.constant 0 : index
      %c0_7 = arith.constant 0 : index
      %8 = vector.load %arg2[%c0_6, %c0_7] : memref<8x128xbf16, #tpu.memory_space<vmem>>, vector<8x128xbf16>
      %c0_8 = arith.constant 0 : index
      %c0_9 = arith.constant 0 : index
      %9 = vector.load %arg3[%c0_8, %c0_9] : memref<128x128xbf16, #tpu.memory_space<vmem>>, vector<128x128xbf16>
      %cst_10 = arith.constant dense<0.000000e+00> : vector<8x128xf32>
      %10 = tpu.matmul %8, %9, %cst_10 {dimension_numbers = #tpu.dot_dimension_numbers<[1], [0], [0], [1], [0, 0, 1, 1], [], []>} : vector<8x128xbf16>, vector<128x128xbf16>, vector<8x128xf32> -> vector<8x128xf32>
      %11 = arith.truncf %10 : vector<8x128xf32> to vector<8x128xbf16>
      %c0_11 = arith.constant 0 : index
      %c0_12 = arith.constant 0 : index
      %12 = vector.load %arg6[%c0_11, %c0_12] : memref<8x128xbf16, #tpu.memory_space<vmem>>, vector<8x128xbf16>
      tpu.vector_store %arg6[%c0_11, %c0_12], %11 {strides = array<i32>} : memref<8x128xbf16, #tpu.memory_space<vmem>>, vector<8x128xbf16>,
    } else {
    }
    %c0 = arith.constant 0 : index
    %c0_1 = arith.constant 0 : index
    %3 = vector.load %arg6[%c0, %c0_1] : memref<8x128xbf16, #tpu.memory_space<vmem>>, vector<8x128xbf16>
    %c0_2 = arith.constant 0 : index
    %c0_3 = arith.constant 0 : index
    %4 = vector.load %arg4[%c0_2, %c0_3] : memref<128x128xbf16, #tpu.memory_space<vmem>>, vector<128x128xbf16>
    %cst = arith.constant dense<0.000000e+00> : vector<8x128xf32>
    %5 = tpu.matmul %3, %4, %cst {dimension_numbers = #tpu.dot_dimension_numbers<[1], [1], [0], [0], [0, 0, 1, 0], [], []>} : vector<8x128xbf16>, vector<128x128xbf16>, vector<8x128xf32> -> vector<8x128xf32>
    %6 = math.tanh %5 : vector<8x128xf32>
    %c0_4 = arith.constant 0 : index
    %c0_5 = arith.constant 0 : index
    %7 = vector.load %arg5[%c0_4, %c0_5] : memref<8x128xf32, #tpu.memory_space<vmem>>, vector<8x128xf32>
    tpu.vector_store %arg5[%c0_4, %c0_5], %6 {strides = array<i32>} : memref<8x128xf32, #tpu.memory_space<vmem>>, vector<8x128xf32>,
    return
  }
  func.func @transform_0(%arg0: i32, %arg1: i32) -> (i32, i32) {
    %c0_i32 = arith.constant 0 : i32
    %c0_i32_0 = arith.constant 0 : i32
    return %arg0, %c0_i32 : i32, i32
  }
  func.func @transform_1(%arg0: i32, %arg1: i32) -> (i32, i32) {
    %c0_i32 = arith.constant 0 : i32
    %c0_i32_0 = arith.constant 0 : i32
    %c0_i32_1 = arith.constant 0 : i32
    return %c0_i32, %c0_i32_0 : i32, i32
  }
  func.func @transform_2(%arg0: i32, %arg1: i32) -> (i32, i32) {
    %c0_i32 = arith.constant 0 : i32
    %c0_i32_0 = arith.constant 0 : i32
    return %arg1, %c0_i32 : i32, i32
  }
  func.func @transform_3(%arg0: i32, %arg1: i32) -> (i32, i32) {
    %c0_i32 = arith.constant 0 : i32
    return %arg0, %arg1 : i32, i32
  }
}

</mosaic_0001>

<bundles_post_ra>
// kernel: _atten_metrix_impl.1
= control target key start
LH: loop header
LB: loop body
LE: loop exit
PB: predicated region body
PF: predicated region fallthrough
CT: control target
= control target key end

     0   :  { %v367_v1 = vmov 0.0   ;;  %vm368_vm0 = vmmov 0   ;;  %s453_s0 = inlined_call_operand.vmem [shape: bf16[8,128], index: 0, kind: input, shape index: {}]   ;;  %s454_s1 = inlined_call_operand.vmem [shape: bf16[128,128], index: 1, kind: input, shape index: {}]   ;;  %s455_s2 = inlined_call_operand.vmem [shape: bf16[128,128], index: 2, kind: input, shape index: {}]   ;;  %s456_s3 = inlined_call_operand.hbm [shape: f32[8,128], index: 3, kind: output, shape index: {}]  }
   0x1   :  { %v325_v0 = vld [vmem:[%s454_s1] sm:$0xff]   ;;  %282 = vmatprep.subr.bf16.mxu0 %v367_v1  ;;  %302 = vmatprep.subr.bf16.mxu1 %v367_v1  ;;  %v326_v2 = vld [vmem:[%s454_s1 + $0x8] sm:$0xff]   ;;  %v327_v3 = vld [vmem:[%s454_s1 + $0x10] sm:$0xff]  }
   0x2   :  { %283 = vmatpush3.bf16.msra.mxu0 %v325_v0  ;;  %298 = vmatprep.mubr.msk.bf16.mxu0 %vm368_vm0, %v367_v1  ;;  %v333_v4 = vld [vmem:[%s455_s2] sm:$0xff]   ;;  %v328_v5 = vld [vmem:[%s454_s1 + $0x18] sm:$0xff]   ;;  %v334_v7 = vld [vmem:[%s455_s2 + $0x8] sm:$0xff]  }
   0x3   :  { %284 = vmatprep.subr.bf16.mxu0 %v367_v1  ;;  %318 = vmatprep.mubr.msk.bf16.mxu1 %vm368_vm0, %v367_v1  ;;  %v329_v6 = vld [vmem:[%s454_s1 + $0x20] sm:$0xff]  }
   0x4   :  { %303 = vmatpush3.bf16.xpose.msra.mxu1 %v333_v4 }
   0x5   :  { %304 = vmatprep.subr.bf16.mxu1 %v367_v1 }
   0x6   :  { %285 = vmatpush3.bf16.msra.mxu0 %v326_v2 }
   0x7   :  { %286 = vmatprep.subr.bf16.mxu0 %v367_v1 }
   0xa   :  { %287 = vmatpush3.bf16.msra.mxu0 %v327_v3 }
   0xb   :  { %288 = vmatprep.subr.bf16.mxu0 %v367_v1 }
   0xe   :  { %289 = vmatpush3.bf16.msra.mxu0 %v328_v5 }
   0xf   :  { %290 = vmatprep.subr.bf16.mxu0 %v367_v1 }
  0x10   :  { %8 = vsyncpa [#allocation4], 0  ;;  %v330_v8 = vld [vmem:[%s454_s1 + $0x28] sm:$0xff]   ;;  %305 = vmatpush3.bf16.xpose.msra.mxu1 %v334_v7  ;;  %v331_v9 = vld [vmem:[%s454_s1 + $0x30] sm:$0xff]   ;;  %s369_s17 = smov [#allocation3]  }
  0x11   :  { %306 = vmatprep.subr.bf16.mxu1 %v367_v1  ;;  %v335_v10 = vld [vmem:[%s455_s2 + $0x10] sm:$0xff]   ;;  %v332_v11 = vld [vmem:[%s454_s1 + $0x38] sm:$0xff]   ;;  %v20_v12 = vld [vmem:[%s453_s0] sm:$0xf]  ;;  %s240_s18 = sshll.u32 %s369_s17, 4  ;;  %s241_s18 = int_to_ptr.vmem [resolvable:$true] %s240_s18 }
  0x12   :  { %291 = vmatpush3.bf16.msra.mxu0 %v329_v6  ;;  %v336_v13 = vld [vmem:[%s455_s2 + $0x18] sm:$0xff]   ;;  %v337_v14 = vld [vmem:[%s455_s2 + $0x20] sm:$0xff]   ;;  %v338_v15 = vld [vmem:[%s455_s2 + $0x28] sm:$0xff]   ;;  %p348_p1 = scmp.lt.s32.totalorder %s241_s18, %s241_s18 }
  0x13   :  { %292 = vmatprep.subr.bf16.mxu0 %v367_v1  ;;  %v339_v16 = vld [vmem:[%s455_s2 + $0x30] sm:$0xff]   ;;  %v340_v17 = vld [vmem:[%s455_s2 + $0x38] sm:$0xff]   ;;  %s343_s2 = scalar_lea.vmem %s241_s18, 128 }
  0x14   :  { %p344_p0 = scmp.ne.s32.totalorder %s241_s18, %s343_s2  ;;  %p349_p2 = scmp.lt.s32.totalorder %s343_s2, %s343_s2 }
  0x16   :  { %293 = vmatpush3.bf16.msra.mxu0 %v330_v8  ;;  %p350_p3 = por %p349_p2, %p348_p1 }
  0x17   :  { %294 = vmatprep.subr.bf16.mxu0 %v367_v1 }
  0x18   :  { %307 = vmatpush3.bf16.xpose.msra.mxu1 %v335_v10  ;;  %p351_p4 = pnand %p350_p3, %p344_p0 }
  0x19   :  { %308 = vmatprep.subr.bf16.mxu1 %v367_v1 }
  0x1a   :  { %295 = vmatpush3.bf16.msra.mxu0 %v331_v9 }
  0x1b   :  { %296 = vmatprep.subr.bf16.mxu0 %v367_v1 }
  0x1e   :  { %297 = vmatpush3.bf16.msra.mxu0 %v332_v11 }
  0x20   :  { %309 = vmatpush3.bf16.xpose.msra.mxu1 %v336_v13 }
  0x21   :  { %299 = vmatmul.mubr.bf16.vlgmr.msra.gmra.mrb[0].mxu0 %v20_v12  ;;  %310 = vmatprep.subr.bf16.mxu1 %v367_v1 }
  0x28   :  { %311 = vmatpush3.bf16.xpose.msra.mxu1 %v337_v14 }
  0x29   :  { %312 = vmatprep.subr.bf16.mxu1 %v367_v1 }
  0x30   :  { %313 = vmatpush3.bf16.xpose.msra.mxu1 %v338_v15 }
  0x31   :  { %314 = vmatprep.subr.bf16.mxu1 %v367_v1 }
  0x38   :  { %315 = vmatpush3.bf16.xpose.msra.mxu1 %v339_v16 }
  0x39   :  { %316 = vmatprep.subr.bf16.mxu1 %v367_v1 }
  0x40   :  { %317 = vmatpush3.bf16.xpose.msra.mxu1 %v340_v17 }
  0xf4   :  { %v119_v18 = vpop.f32.mrb[0].mxu0 }
  0xf5   :  { %v125_v19 = vpack.c.bf16 %v119_v18, %v119_v18  ;;  %v300_v20 = vpop.f32.mrb[1].mxu0 }
  0xf6   :  { %v122_v21 = vpop.f32.mrb[2].mxu0 }
  0xf7   :  { %126 = vst [vmem:[#allocation2] sm:$0xf] %v125_v19  ;;  %v301_v22 = vpop.f32.mrb[3].mxu0 }
  0xfe   :  { %v127_v23 = vld [vmem:[#allocation2] sm:$0xf] }
  0xff   :  { %319 = vmatmul.mubr.bf16.vlgmr.msra.gmra.mrb[0].mxu1 %v127_v23 }
 0x1d2   :  { %v226_v24 = vpop.f32.mrb[0].mxu1 }
 0x1d3   :  { %341 = vtanh.f32 %v226_v24  ;;  %v320_v25 = vpop.f32.mrb[1].mxu1 }
 0x1d4   :  { %v229_v26 = vpop.f32.mrb[2].mxu1 }
 0x1d5   :  { %v321_v27 = vpop.f32.mrb[3].mxu1 }
 0x1dd   :  { %v342_v28 = vpop.eup %341 }
 0x1de   :  { %233 = vst [vmem:[#allocation3] sm:$0xff] %v342_v28 }
 0x1df   :  { %354 = shalt.err (!%p351_p4)
}
 0x1e0   :  { %s355_s21 = scalar_lea.hbm %s456_s3, 128 }
 0x1e1   :  { %p356_p5 = scmp.ne.s32.totalorder %s456_s3, %s355_s21  ;;  %p359_p6 = scmp.lt.u32.totalorder %s355_s21, %s456_s3 }
 0x1e3   :  { %p361_p7 = pnand %p359_p6, %p356_p5 }
 0x1e5   :  { %364 = shalt.err (!%p361_p7)
}
 0x1e6   :  { %243 = dma.vmem_to_hbm [thread:$0]  %s241_s18, 128, %s456_s3, [#allocation4]  }
 0x1e7   :  { %365 = dma.done.wait [#allocation4], 128  }
 0x1e8   :  { %366 = vsyncadd [#allocation4], 4294967168 }
 0x1e9   :  { %247 = vsyncpa [#allocation4], 1 }

</bundles_post_ra>
